<compile_context>
chip_gen: v6e
topology: v6e:2x2x1
jax: 0.10.0
libtpu: 0.0.40
codegen_flags: <defaults>
</compile_context>

<pallas_src>
import math

import jax
import jax.numpy as jnp
from jax.experimental import pallas as pl
from jax.experimental.pallas import tpu as pltpu

_LANES = 128


def _copy_kernel(x_ref, o_ref):
    o_ref[...] = x_ref[...]


def _tpu_generation() -> int:
    """Best-effort TPU generation from device_kind; defaults to 6."""
    try:
        kind = jax.devices()[0].device_kind.lower()
    except Exception:
        return 6
    for g in (7, 6, 5, 4, 3, 2):
        if str(g) in kind:
            return g
    return 6


def _tuning(gen: int):
    """(single_block_bytes, tile_bytes, vmem_limit_bytes or None) per chip."""
    if gen >= 7:
        # 2 TCs, 64 MiB VMEM, ~3.2 TB/s HBM: keep medium/large slabs on the
        # >=2-step parallel grid; 8 MiB tiles amortize the ~0.35 us/step cost.
        # 4 buffers x 8 MiB = 32 MiB > 32 MiB default scoped limit -> 48 MiB.
        return 4 << 20, 8 << 20, 48 << 20
    if gen == 6:
        # Single TC, 128 MiB VMEM: a grid buys nothing for a BW-bound copy, so
        # push the grid-less single-block threshold up; 8 MiB tiles otherwise.
        return 16 << 20, 8 << 20, 64 << 20
    if gen == 5:
        # v5e: per-step overhead is already ~7% at 2 MiB tiles; keep them but
        # raise the scoped limit so the 16 MiB single block (in+out=32 MiB)
        # fits (default scoped limit on v5e is only 16 MiB).
        return 16 << 20, 2 << 20, 64 << 20
    # Older / unknown chips: conservative defaults, no explicit VMEM override.
    return 4 << 20, 2 << 20, None


def _lane_cols(n: int):
    """Widest multiple of 128 (capped at 8192) that divides n, else None."""
    for cols in (8192, 4096, 2048, 1024, 512, 256, 128):
        if n % cols == 0:
            return cols
    return None


def _fallback_cols(n: int) -> int:
    """Largest divisor of n <= 8192.

    The block's last dim then equals the full array dim, which is exempt from
    the 128-lane divisibility rule, so no wrapper-side pad/slice copies are
    ever materialized (edge stores may be masked, but HBM traffic stays 2xN).
    """
    best, d = 1, 1
    while d * d <= n:
        if n % d == 0:
            lo, hi = d, n // d
            if lo <= 8192:
                best = max(best, lo)
            if hi <= 8192:
                best = max(best, hi)
        d += 1
    return best


def _compiler_params(vmem_limit, parallel_grid: bool):
    kwargs = {}
    if parallel_grid:
        kwargs["dimension_semantics"] = ("parallel",)
    if vmem_limit is not None:
        kwargs["vmem_limit_bytes"] = vmem_limit
    return pltpu.CompilerParams(**kwargs)


def _identity_pallas(x: jax.Array) -> jax.Array:
    """Pass x through a Pallas identity-copy kernel (input aliased to output)."""
    shape, dtype = x.shape, x.dtype
    n = math.prod(shape)  # Python-side; no device op / host sync
    if n == 0:
        return x

    itemsize = jnp.dtype(dtype).itemsize
    total_bytes = n * itemsize
    gen = _tpu_generation()
    single_block_bytes, tile_bytes, vmem_limit = _tuning(gen)
    # Dtype-aware sublane rounding: 8 rows for 32-bit, 16 for 16-bit, 32 for 8-bit.
    sublanes = max(8, 32 // itemsize)

    cols = _lane_cols(n)
    if cols is None:
        cols = _fallback_cols(n)
    rows = n // cols
    slab = x.reshape(rows, cols)

    # VMEM footprint accounting uses the padded (sublane, lane) layout.
    lane_cols = pl.cdiv(cols, _LANES) * _LANES
    padded_bytes = (pl.cdiv(rows, sublanes) * sublanes) * lane_cols * itemsize

    # Advisory hint: pure memory op, 2xN bytes, zero flops -> lets XLA overlap
    # the custom call with surrounding work.
    cost = pl.CostEstimate(flops=0, transcendentals=0,
                           bytes_accessed=2 * total_bytes)

    if padded_bytes <= single_block_bytes:
        # One grid-less block: single DMA in/out, zero per-grid-step overhead.
        out = pl.pallas_call(
            _copy_kernel,
            out_shape=jax.ShapeDtypeStruct((rows, cols), dtype),
            input_output_aliases={0: 0},
            cost_estimate=cost,
            compiler_params=_compiler_params(vmem_limit, parallel_grid=False),
        )(slab)
    else:
        # Lane-dense row tiles; 2 buffers x (in + out) x tile stays well inside
        # the (raised) scoped-VMEM limit on every generation.
        target_rows = max(sublanes, tile_bytes // (lane_cols * itemsize))
        row_tile = min((rows // sublanes) * sublanes,
                       (target_rows // sublanes) * sublanes)
        row_tile = max(sublanes, row_tile)
        if gen >= 7:
            # Guarantee >=2 grid steps so the "parallel" 1-D grid shards the
            # copy across both v7x TensorCores (each has its own DMA path).
            half = max(sublanes, pl.cdiv(rows, 2 * sublanes) * sublanes)
            row_tile = min(row_tile, half)
        grid = (pl.cdiv(rows, row_tile),)
        spec = pl.BlockSpec((row_tile, cols), lambda i: (i, 0))
        out = pl.pallas_call(
            _copy_kernel,
            out_shape=jax.ShapeDtypeStruct((rows, cols), dtype),
            grid_spec=pltpu.PrefetchScalarGridSpec(
                num_scalar_prefetch=0,
                grid=grid,
                in_specs=[spec],
                out_specs=spec,
            ),
            input_output_aliases={0: 0},
            cost_estimate=cost,
            compiler_params=_compiler_params(vmem_limit, parallel_grid=True),
        )(slab)

    return out.reshape(shape)


class Print:
    """JAX/Pallas equivalent of the PyTorch `Print` module.

    forward(x): prints x (or f(x)) and returns x unchanged.  The value
    pass-through runs through a Pallas identity-copy kernel (input aliased to
    output); the print itself is a host-side Python side effect.
    """

    def __init__(self, f=None):
        self.f = f

    def __call__(self, x):
        # TODO(synk): printing a full tensor's contents has no in-kernel Pallas
        # equivalent; the print is host-side.  Under jax.jit this would print a
        # tracer at trace time (use jax.debug.print there) — eager use matches
        # the PyTorch semantics exactly.
        if self.f is None:
            print(x)
        else:
            print(self.f(x))
        return _identity_pallas(x)


if __name__ == "__main__":
    import contextlib
    import io

    key = jax.random.PRNGKey(0)
    k1, k2, k3 = jax.random.split(key, 3)

    # Small NCHW input (grid-less single-block kernel path).
    x = jax.random.normal(k1, (2, 4, 16, 16), dtype=jnp.float32)

    # Path 1: Print() -> prints x, returns x unchanged.
    printer = Print()
    buf = io.StringIO()
    with contextlib.redirect_stdout(buf):  # capture the module's print
        out = printer(x)
    out = jax.block_until_ready(out)
    assert out.shape == x.shape and out.dtype == x.dtype
    assert jnp.array_equal(out, x), "identity pass-through mismatch"
    assert len(buf.getvalue()) > 0, "Print module produced no output"

    # Path 2: Print(f) -> prints f(x), returns x unchanged.
    printer_f = Print(f=lambda t: jnp.sum(t))
    buf_f = io.StringIO()
    with contextlib.redirect_stdout(buf_f):
        out_f = printer_f(x)
    out_f = jax.block_until_ready(out_f)
    assert jnp.array_equal(out_f, x), "identity pass-through mismatch (f path)"
    assert len(buf_f.getvalue()) > 0, "Print(f) module produced no output"

    # Non-128-divisible element count: exercises the no-pad fallback layout
    # (last block dim == full array dim, no extra HBM traffic).
    odd = jax.random.normal(k2, (3, 5, 7, 11), dtype=jnp.float32)
    with contextlib.redirect_stdout(io.StringIO()):
        out_odd = jax.block_until_ready(Print()(odd))
    assert jnp.array_equal(out_odd, odd), "fallback-layout copy mismatch"

    # 32 MiB tensor: exceeds every generation's single-block threshold, so the
    # tiled multi-step ("parallel") path is exercised on v5e/v6e/v7x alike.
    big = jax.random.normal(k3, (4, 16, 512, 256), dtype=jnp.float32)
    with contextlib.redirect_stdout(io.StringIO()):
        out_big = jax.block_until_ready(Print()(big))
    assert jnp.array_equal(out_big, big), "tiled identity copy mismatch"

    print("KERNEL_OK")
</pallas_src>

<mosaic_0001>
module attributes {stable_mosaic.version = 11 : i64} {
  func.func @_copy_kernel(%arg0: memref<1x2048xf32, #tpu.memory_space<vmem>>, %arg1: memref<1x2048xf32, #tpu.memory_space<vmem>>) attributes {dimension_semantics = [], scalar_prefetch = 0 : i64, scratch_operands = 0 : i64, tpu.core_type = #tpu.core_type<tc>} {
    %c0 = arith.constant 0 : index
    %c0_0 = arith.constant 0 : index
    %0 = vector.load %arg0[%c0, %c0_0] : memref<1x2048xf32, #tpu.memory_space<vmem>>, vector<1x2048xf32>
    %c0_1 = arith.constant 0 : index
    %c0_2 = arith.constant 0 : index
    %1 = vector.load %arg1[%c0_1, %c0_2] : memref<1x2048xf32, #tpu.memory_space<vmem>>, vector<1x2048xf32>
    tpu.vector_store %arg1[%c0_1, %c0_2], %0 {strides = array<i32>} : memref<1x2048xf32, #tpu.memory_space<vmem>>, vector<1x2048xf32>,
    return
  }
}

</mosaic_0001>

<bundles_post_ra>
// kernel: tpu_custom_call.1
= control target key start
LH: loop header
LB: loop body
LE: loop exit
PB: predicated region body
PF: predicated region fallthrough
CT: control target
= control target key end

     0   :  { %6 = vsyncpa [#allocation3], 0  ;;  %s104_s0 = inlined_call_operand.hbm [shape: f32[1,2048], index: 0, kind: input, shape index: {}, may-alias: {0,1}]   ;;  %s105_s1 = inlined_call_operand.hbm [shape: f32[1,2048], index: 1, kind: output, shape index: {}, may-alias: {0,1}]  }
   0x1   :  { %7 = vsyncpa [#allocation4], 0  ;;  %s86_s6 = smov [#allocation2]  }
   0x2   :  { %s14_s7 = sshll.u32 %s86_s6, 4  ;;  %s15_s7 = int_to_ptr.vmem [resolvable:$true] %s14_s7 }
   0x3   :  { %s50_s8 = scalar_lea.vmem %s15_s7, 256  ;;  %p55_p1 = scmp.lt.s32.totalorder %s15_s7, %s15_s7 }
   0x4   :  { %p51_p0 = scmp.ne.s32.totalorder %s15_s7, %s50_s8  ;;  %p56_p2 = scmp.lt.s32.totalorder %s50_s8, %s50_s8 }
   0x6   :  { %p57_p3 = por %p56_p2, %p55_p1 }
   0x8   :  { %p58_p4 = pnand %p57_p3, %p51_p0 }
   0xa   :  { %61 = shalt.err (!%p58_p4)
}
   0xb   :  { %17 = dma.hbm_to_vmem [thread:$0]  %s104_s0, 256, %s15_s7, [#allocation3]  }
   0xc   :  { %82 = dma.done.wait [#allocation3], 256  }
   0xd   :  { %83 = vsyncadd [#allocation3], 4294967040  ;;  %s87_s11 = smov [#allocation5]   ;;  %v21_v0 = vld [vmem:[#allocation2] sm:$0xff]  ;;  %v22_v1 = vld [vmem:[#allocation2 + $0x8] sm:$0xff] }
   0xe   :  { %s31_s12 = sshll.u32 %s87_s11, 4  ;;  %23 = vst [vmem:[#allocation5] sm:$0xff] %v21_v0  ;;  %24 = vst [vmem:[#allocation5 + $0x8] sm:$0xff] %v22_v1  ;;  %s32_s12 = int_to_ptr.vmem [resolvable:$true] %s31_s12 }
   0xf   :  { %s62_s13 = scalar_lea.vmem %s32_s12, 256  ;;  %p67_p6 = scmp.lt.s32.totalorder %s32_s12, %s32_s12 }
  0x10   :  { %p63_p5 = scmp.ne.s32.totalorder %s32_s12, %s62_s13  ;;  %p68_p7 = scmp.lt.s32.totalorder %s62_s13, %s62_s13 }
  0x12   :  { %p69_p8 = por %p68_p7, %p67_p6 }
  0x14   :  { %p70_p9 = pnand %p69_p8, %p63_p5 }
  0x16   :  { %73 = shalt.err (!%p70_p9)
}
  0x17   :  { %34 = dma.vmem_to_hbm [thread:$0]  %s32_s12, 256, %s105_s1, [#allocation4]  }
  0x18   :  { %84 = dma.done.wait [#allocation4], 256  }
  0x19   :  { %85 = vsyncadd [#allocation4], 4294967040 }
  0x1a   :  { %38 = vsyncpa [#allocation3], 1 }
  0x1b   :  { %39 = vsyncpa [#allocation4], 1 }

</bundles_post_ra>
